<compile_context>
chip_gen: v7x
topology: tpu7x:2x2x1
jax: 0.10.0
libtpu: 0.0.40
codegen_flags: <defaults>
</compile_context>

<pallas_src>
import functools

import jax
import jax.numpy as jnp
from jax.experimental import pallas as pl
from jax.experimental.pallas import tpu as pltpu


_LANES = 128


def _activation_kernel(x_ref, o_ref, *, func: str):
    x = x_ref[...]
    if func == "quad":
        y = x * x
    elif func == "sin":
        y = jnp.sin(x)
    elif func == "relu":
        y = jnp.maximum(x, 0)
    else:
        raise NotImplementedError(func)
    o_ref[...] = y.astype(o_ref.dtype)


def _xla_activation(x, func: str):
    # Used only for the (rare) <128-element ragged tail / tiny inputs.
    if func == "quad":
        return x * x
    elif func == "sin":
        return jnp.sin(x)
    elif func == "relu":
        return jnp.maximum(x, 0)
    raise NotImplementedError(func)


def _target_block_bytes() -> int:
    """Per-block byte budget, generation-gated.

    v5e: 2 MiB blocks -> 8 MiB total (2 arrays x 2 buffers), under its 16 MiB
    scoped-VMEM default.  v6e/v7x: 4 MiB blocks -> 16 MiB total, under their
    32 MiB scoped defaults and cheaper relative to their faster HBM.
    """
    try:
        kind = jax.devices()[0].device_kind.lower()
    except Exception:  # pragma: no cover - be conservative if query fails
        return 2 * 1024 * 1024
    if ("v6" in kind) or ("v7" in kind):
        return 4 * 1024 * 1024
    return 2 * 1024 * 1024


def _sublane_multiple(itemsize: int) -> int:
    # Sub-32-bit dtypes pack along sublanes: f32 -> 8, bf16 -> 16, int8/fp8 -> 32.
    return max(8, 32 // max(1, itemsize))


def _activation_2d(x2d: jax.Array, func: str) -> jax.Array:
    """Lane-dense (rows, 128) elementwise activation via pallas_call."""
    rows = x2d.shape[0]
    itemsize = jnp.dtype(x2d.dtype).itemsize
    sub_mult = _sublane_multiple(itemsize)

    # Max rows per block from the byte budget, rounded to the sublane multiple.
    max_rows = max(sub_mult,
                   (_target_block_bytes() // (_LANES * itemsize)) // sub_mult * sub_mult)

    if rows > max_rows:
        block_rows = max_rows
    elif rows >= 2 * sub_mult:
        # Would otherwise be a single block: split so the grid has >=2 steps
        # and v7x's two TensorCores both get work (no-op cost on v5e/v6e).
        half = pl.cdiv(rows, 2)
        block_rows = max(sub_mult, (half // sub_mult) * sub_mult)
    else:
        # Too small to split on a sublane boundary: one full-extent block
        # (block shape == array shape satisfies the (8,128) rule).
        block_rows = rows

    grid = (pl.cdiv(rows, block_rows),)
    n = rows * _LANES
    cost = pl.CostEstimate(
        flops=n,
        transcendentals=(n if func == "sin" else 0),
        bytes_accessed=2 * n * itemsize,
    )

    kernel = functools.partial(_activation_kernel, func=func)
    return pl.pallas_call(
        kernel,
        out_shape=jax.ShapeDtypeStruct((rows, _LANES), x2d.dtype),
        grid_spec=pltpu.PrefetchScalarGridSpec(
            num_scalar_prefetch=0,
            grid=grid,
            in_specs=[pl.BlockSpec((block_rows, _LANES), lambda i: (i, 0))],
            out_specs=pl.BlockSpec((block_rows, _LANES), lambda i: (i, 0)),
        ),
        compiler_params=pltpu.CompilerParams(
            dimension_semantics=("parallel",),
        ),
        cost_estimate=cost,
    )(x2d)


def activation(x: jax.Array, func: str) -> jax.Array:
    """Elementwise activation matching the PyTorch Activation module."""
    orig_shape = x.shape
    n = x.size
    if n == 0:
        return x

    flat = x.reshape(-1)  # reshape of a contiguous array: no HBM traffic
    n_main = (n // _LANES) * _LANES
    tail = n - n_main

    if n_main == 0:
        # Tiny (<128 elements) input: not worth a kernel launch.
        return _xla_activation(flat, func).reshape(orig_shape)

    main = flat[:n_main] if tail else flat
    out_main = _activation_2d(main.reshape(n_main // _LANES, _LANES), func)
    out_flat = out_main.reshape(-1)

    if tail:
        # <128-element ragged tail: plain XLA, keeps the hot path unmasked.
        out_tail = _xla_activation(flat[n_main:], func)
        out_flat = jnp.concatenate([out_flat, out_tail])

    return out_flat.reshape(orig_shape)


def _reference(x, func):
    if func == "quad":
        return x ** 2
    elif func == "sin":
        return jnp.sin(x)
    elif func == "relu":
        return jnp.maximum(x, 0)
    raise NotImplementedError(func)


if __name__ == "__main__":
    key = jax.random.PRNGKey(0)
    # Small NCHW input consistent with a conv-style tensor.
    x = jax.random.normal(key, (2, 4, 16, 16), dtype=jnp.float32)

    ok = True
    for func in ("quad", "sin", "relu"):
        y = activation(x, func)
        jax.block_until_ready(y)
        y_ref = _reference(x, func)
        if y.shape != x.shape or y.dtype != x.dtype:
            ok = False
        if not jnp.allclose(y, y_ref, atol=1e-6, rtol=1e-6):
            ok = False

    # Also exercise a non-128-multiple size (tail path) and bf16 rounding.
    x_odd = jax.random.normal(jax.random.PRNGKey(1), (3, 5, 7), dtype=jnp.float32)
    for func in ("quad", "sin", "relu"):
        y = activation(x_odd, func)
        jax.block_until_ready(y)
        if not jnp.allclose(y, _reference(x_odd, func), atol=1e-6, rtol=1e-6):
            ok = False

    x_bf16 = jax.random.normal(jax.random.PRNGKey(2), (4, 8, 16, 16)).astype(jnp.bfloat16)
    for func in ("quad", "sin", "relu"):
        y = activation(x_bf16, func)
        jax.block_until_ready(y)
        if y.dtype != jnp.bfloat16:
            ok = False
        if not jnp.allclose(y.astype(jnp.float32),
                            _reference(x_bf16.astype(jnp.float32), func),
                            atol=2e-2, rtol=2e-2):
            ok = False

    print("KERNEL_OK" if ok else "KERNEL_MISMATCH")
</pallas_src>

<mosaic_0001>
module attributes {stable_mosaic.version = 11 : i64} {
  func.func @_activation_kernel(%arg0: i32, %arg1: memref<8x128xf32, #tpu.memory_space<vmem>>, %arg2: memref<8x128xf32, #tpu.memory_space<vmem>>) attributes {dimension_semantics = [#tpu.dimension_semantics<parallel>], iteration_bounds = array<i64: 2>, scalar_prefetch = 0 : i64, scratch_operands = 0 : i64, tpu.core_type = #tpu.core_type<tc>, window_params = [{transform_indices = @transform_0, window_bounds = array<i64: 8, 128>}, {transform_indices = @transform_1, window_bounds = array<i64: 8, 128>}]} {
    %c0 = arith.constant 0 : index
    %c0_0 = arith.constant 0 : index
    %0 = vector.load %arg1[%c0, %c0_0] : memref<8x128xf32, #tpu.memory_space<vmem>>, vector<8x128xf32>
    %1 = arith.mulf %0, %0 : vector<8x128xf32>
    %c0_1 = arith.constant 0 : index
    %c0_2 = arith.constant 0 : index
    %2 = vector.load %arg2[%c0_1, %c0_2] : memref<8x128xf32, #tpu.memory_space<vmem>>, vector<8x128xf32>
    tpu.vector_store %arg2[%c0_1, %c0_2], %1 {strides = array<i32>} : memref<8x128xf32, #tpu.memory_space<vmem>>, vector<8x128xf32>,
    return
  }
  func.func @transform_0(%arg0: i32) -> (i32, i32) {
    %c0_i32 = arith.constant 0 : i32
    %c0_i32_0 = arith.constant 0 : i32
    return %arg0, %c0_i32 : i32, i32
  }
  func.func @transform_1(%arg0: i32) -> (i32, i32) {
    %c0_i32 = arith.constant 0 : i32
    %c0_i32_0 = arith.constant 0 : i32
    return %arg0, %c0_i32 : i32, i32
  }
}

</mosaic_0001>

<bundles_post_ra>
// kernel: tpu_custom_call.1
= control target key start
LH: loop header
LB: loop body
LE: loop exit
PB: predicated region body
PF: predicated region fallthrough
CT: control target
= control target key end

     0   :  { %6 = vsyncpa [#allocation3], 0  ;;  %s548_s0 = inlined_call_operand.hbm [shape: f32[16,128], index: 0, kind: input, shape index: {}]   ;;  %s549_s1 = inlined_call_operand.hbm [shape: f32[16,128], index: 1, kind: output, shape index: {}]  }
   0x1   :  { %8 = vsyncpa [#allocation3 + $0x1], 0 }
   0x2   :  { %9 = vsyncpa [#allocation4], 0 }
   0x3   :  { %11 = vsyncpa [#allocation4 + $0x1], 0  ;;  %s387_s6 = smov 0   ;;  %s389_s7 = smov 0  }
   0x4   :  { %s391_s8 = smov 0   ;;  %s393_s9 = smov 0  }
   0x5 LB: > { %s408_s10 = sadd.s32 4294967295, %s373_s9   ;;  %s219_s11 = sadd.s32 4294967294, %s373_s9   ;;  %s373_s9 = sphi %s393_s9, %s564_s9   ;;  %s369_s8 = sphi %s391_s8, %s563_s8   ;;  %s365_s7 = sphi %s389_s7, %s562_s7   ;;  %s361_s6 = sphi %s387_s6, %s561_s6  }
   0x6   : > { %s412_s12 = sadd.s32 1, %s373_s9   ;;  %s24_s13 = sadd.s32 1, %s369_s8 }
   0x7   : > { %s21_s14 = ssub.s32 %s373_s9, %s412_s12  ;;  %p31_p0 = scmp.ne.s32.totalorder %s369_s8, %s365_s7 }
   0x8   : > { %p22_p1 = scmp.eq.s32.totalorder %s21_s14, 0  ;;  %p32_p2 = scmp.eq.s32.totalorder %s373_s9, 0 }
   0x9   : > { %p37_p3 = scmp.ne.s32.totalorder %s365_s7, %s361_s6  ;;  %p38_p4 = scmp.eq.s32.totalorder %s408_s10, 0 }
   0xa   : > { %s424_s15 = scalar_select %p22_p1, %s369_s8, %s24_s13  }
   0xb   : > { %p426_p5 = por %p32_p2, %p31_p0  ;;  %p430_p6 = por %p38_p4, %p37_p3 }
   0xc   : > { %p61_p7 = scmp.eq.s32.totalorder %s408_s10, 1  ;;  %p67_p8 = scmp.eq.s32.totalorder %s219_s11, 1 }
   0xd   : > { %p243_p10 = scmp.lt.s32.totalorder %s373_s9, 2  ;;  %s87_s20 = sand.u32 1, %s369_s8  }
   0xe   : > { %p437_p11 = por %p61_p7, %p31_p0  ;;  %p441_p12 = por %p67_p8, %p37_p3 }
   0xf   : > { %s223_s21 = sshll.u32 %s373_s9, 7  ;;  %s222_s22 = sshll.u32 %s87_s20, 3 }
  0x10   : > { %s553_s18 = scalar_select %p437_p11, 1, 0 }
  0x11   : > { %s554_s19 = scalar_select %p441_p12, 1, 0 }
  0x12   : > { %s450_s25 = scalar_lea.hbm %s548_s0, %s223_s21  ;;  %s91_s26 = scalar_lea.vmem [#allocation2], %s222_s22 }
  0x13   : > { %s98_s27 = sshll.u32 %s91_s26, 4  ;;  %p454_p13 = pnand %p243_p10, %p426_p5  ;;  %s458_s27 = int_to_ptr.vmem [resolvable:$true] %s98_s27 }
  0x14   : > { %s88_s29 = scalar_lea.sflag [#allocation3], %s87_s20  ;;  %s277_s30 = scalar_lea.hbm %s450_s25, 128 }
  0x15   : > { %p278_p2 = scmp.ne.s32.totalorder %s450_s25, %s277_s30  ;;  %p279_p3 = pneg %p454_p13 }
  0x16   : > { %s282_s4 = scalar_lea.hbm %s548_s0, 256  ;;  %p283_p5 = scmp.lt.u32.totalorder %s450_s25, %s548_s0 }
  0x17   : > { %p280_p4 = pnand %p279_p3, %p278_p2  ;;  %p284_p8 = scmp.lt.u32.totalorder %s282_s4, %s277_s30 }
  0x18   : > { %p286_p9 = scmp.lt.u32.totalorder %s277_s30, %s450_s25 }
  0x19   : > { %p281_p7 = pneg %p280_p4  ;;  %p285_p10 = por %p284_p8, %p283_p5 }
  0x1b   : > { %p287_p0 = por %p286_p9, %p285_p10 }
  0x1d   : > { %p288_p1 = pnand %p287_p0, %p281_p7 }
  0x1f   : > { %291 = shalt.err (!%p288_p1)
}
  0x20   : > { %s292_s13 = scalar_lea.vmem %s458_s27, 128  ;;  %s375_s14 = smov [#allocation2]  }
  0x21   : > { %p293_p2 = scmp.ne.s32.totalorder %s458_s27, %s292_s13  ;;  %s297_s16 = sshll.u32 %s375_s14, 4  ;;  %s298_s16 = int_to_ptr.vmem [resolvable:$false] %s297_s16 }
  0x22   : > { %s299_s20 = scalar_lea.vmem %s298_s16, 256  ;;  %p300_p11 = scmp.lt.s32.totalorder %s458_s27, %s298_s16 }
  0x23   : > { %p295_p4 = pnand %p293_p2, %p279_p3  ;;  %p301_p5 = scmp.lt.s32.totalorder %s299_s20, %s292_s13 }
  0x25   : > { %p296_p12 = pneg %p295_p4  ;;  %p302_p8 = por %p301_p5, %p300_p11 }
  0x27   : > { %p303_p9 = pnand %p302_p8, %p296_p12 }
  0x29   : > { %306 = shalt.err (!%p303_p9)
}
  0x2a   : > { %238 = dma.hbm_to_vmem [thread:$0]  (!%p454_p13), %s450_s25, 128, %s458_s27, %s88_s29  }
  0x2b   : > { %p556_p0 = scmp.lt.s32.totalorder %s373_s9, 3  ;;  %p557_p1 = scmp.ge.s32.totalorder %s373_s9, 1 }
  0x2d   : > { %p104_p3 = pnand %p557_p1, %p556_p0 }
  0x2e   : > { %s492_s21 = sand.u32 (!%p104_p3), 1, %s365_s7  }
  0x2f   : > { %107 = sbr.rel (%p104_p3) target bundleno = 81 (0x51), region = 24  ;;  %s225_s22 = sshll.u32 (!%p104_p3), %s492_s21, 3 }
  0x30   : > { %s110_s23 = scalar_lea.sflag (!%p104_p3), [#allocation3], %s492_s21  ;;  %s113_s24 = scalar_lea.vmem (!%p104_p3), [#allocation2], %s225_s22 }
  0x36   : > { %352 = dma.done.wait (%p430_p6), %s110_s23, 128  }
  0x37   : > { %354 = vsyncadd (%p430_p6), %s110_s23, 4294967168  ;;  %s131_s25 = scalar_lea.vmem [#allocation5], %s225_s22  ;;  %s228_s27 = sshll.u32 %s408_s10, 7  ;;  %v132_v0 = vld [vmem:[%s113_s24] sm:$0xff] }
  0x38   : > { %s149_s26 = sshll.u32 %s131_s25, 4  ;;  %v133_v1 = vmul.f32 %v132_v0, %v132_v0  ;;  %s506_s30 = scalar_lea.hbm %s549_s1, %s228_s27  ;;  %s501_s26 = int_to_ptr.vmem [resolvable:$true] %s149_s26 }
  0x39   : > { %s136_s17 = scalar_lea.sflag [#allocation4], %s492_s21  ;;  %s307_s2 = scalar_lea.vmem %s501_s26, 128 }
  0x3a   : > { %134 = vst [vmem:[%s131_s25] sm:$0xff] %v133_v1  ;;  %p308_p6 = scmp.ne.s32.totalorder %s501_s26, %s307_s2  ;;  %p558_p11 = scmp.ne.s32.totalorder %s553_s18, 0 }
  0x3b   : > { %s376_s10 = smov [#allocation5]  }
  0x3c   : > { %p309_p12 = pnand %p308_p6, %p558_p11  ;;  %s311_s3 = sshll.u32 %s376_s10, 4  ;;  %s312_s3 = int_to_ptr.vmem [resolvable:$false] %s311_s3 }
  0x3d   : > { %s313_s4 = scalar_lea.vmem %s312_s3, 256  ;;  %p314_p7 = scmp.lt.s32.totalorder %s501_s26, %s312_s3 }
  0x3e   : > { %p310_p13 = pneg %p309_p12  ;;  %p315_p10 = scmp.lt.s32.totalorder %s313_s4, %s307_s2 }
  0x40   : > { %p316_p2 = por %p315_p10, %p314_p7 }
  0x42   : > { %p317_p4 = pnand %p316_p2, %p310_p13 }
  0x44   : > { %320 = shalt.err (!%p317_p4)
}
  0x45   : > { %s321_s5 = scalar_lea.hbm %s506_s30, 128  ;;  %s325_s14 = scalar_lea.hbm %s549_s1, 256 }
  0x46   : > { %p322_p5 = scmp.ne.s32.totalorder %s506_s30, %s321_s5  ;;  %p326_p0 = scmp.lt.u32.totalorder %s506_s30, %s549_s1 }
  0x47   : > { %p327_p1 = scmp.lt.u32.totalorder %s325_s14, %s321_s5  ;;  %p329_p6 = scmp.lt.u32.totalorder %s321_s5, %s506_s30 }
  0x48   : > { %p323_p8 = pnand %p322_p5, %p558_p11 }
  0x49   : > { %p328_p3 = por %p327_p1, %p326_p0 }
  0x4a   : > { %p324_p9 = pneg %p323_p8 }
  0x4b   : > { %p330_p12 = por %p329_p6, %p328_p3 }
  0x4d   : > { %p331_p13 = pnand %p330_p12, %p324_p9 }
  0x4f   : > { %334 = shalt.err (!%p331_p13)
}
  0x50   : > { %233 = dma.vmem_to_hbm [thread:$0]  (%p558_p11), %s501_s26, 128, %s506_s30, %s136_s17  }
  0x51 PF: > { %s161_s21 = sand.u32 1, %s361_s6   ;;  %p559_p7 = scmp.ne.s32.totalorder %s554_s19, 0 }
  0x52   : > { %p560_p10 = scmp.ge.s32.totalorder %s373_s9, 2  ;;  %s162_s22 = scalar_lea.sflag [#allocation4], %s161_s21 }
  0x54   : > { %p240_p2 = pnand %p560_p10, %p559_p7 }
  0x56   : > { %356 = dma.done.wait (!%p240_p2), %s162_s22, 128  }
  0x57   : > { %358 = vsyncadd (!%p240_p2), %s162_s22, 4294967168  ;;  %p14_p4 = scmp.ge.s32.totalorder %s412_s12, 4   ;;  %s561_s6 = smov %s365_s7 }
  0x58   : > { %s562_s7 = smov %s369_s8  ;;  %s563_s8 = smov %s424_s15 }
  0x59   : > { %s564_s9 = smov %s412_s12  ;;  %16 = sbr.rel (!%p14_p4) target bundleno = 5 (0x5), region = 69 }
  0x60   :  { %167 = vsyncpa [#allocation3], 1 }
  0x61   :  { %169 = vsyncpa [#allocation3 + $0x1], 1 }
  0x62   :  { %170 = vsyncpa [#allocation4], 1 }
  0x63   :  { %172 = vsyncpa [#allocation4 + $0x1], 1 }

</bundles_post_ra>
